<compile_context>
chip_gen: v6e
topology: v6e:2x2x1
jax: 0.10.0
libtpu: 0.0.40
codegen_flags: <defaults>
</compile_context>

<pallas_src>
import functools
import math

import jax
import jax.numpy as jnp
from jax.experimental import pallas as pl
from jax.experimental.pallas import tpu as pltpu

_LANES = 128  # TPU vreg lane width


def _lcm(a: int, b: int) -> int:
    return a * b // math.gcd(a, b)


def _translation_kernel(pat_ref, x_ref, o_ref, *, reps):
    # pat_ref: (1, PR, 128)  -- per-batch periodic translation pattern, VMEM-resident
    #                           (re-fetched only when the batch index changes).
    # x_ref / o_ref: (1, tr, 128) lane-dense tile of this batch's flattened
    #                coordinates, tr == reps * PR.
    #
    # The tile rows are grouped into `reps` slabs of PR rows; the pattern is
    # identical for every slab (tr and the tile start row are multiples of PR,
    # and PR*128 is a multiple of D), so a broadcast add suffices -- no iota,
    # no integer mod, no selects in the hot loop.
    pr = pat_ref.shape[1]
    lanes = pat_ref.shape[2]
    x = x_ref[...]
    x4 = x.reshape(1, reps, pr, lanes)            # free: PR % sublane == 0
    pat = jnp.expand_dims(pat_ref[...], 1)        # (1, 1, PR, 128), broadcast over reps
    o_ref[...] = (x4 + pat).reshape(x.shape).astype(o_ref.dtype)


def translation(xyz: jax.Array, delta: jax.Array, *,
                block_rows: int = 4096,
                min_pallas_bytes: int = 1 << 18,
                donate_input: bool = False) -> jax.Array:
    """xyz: (B, N, D), delta: (B, 1, D) -> xyz + delta (broadcast over N)."""
    B, N, D = xyz.shape
    assert delta.shape == (B, 1, D)

    dtype = xyz.dtype
    itemsize = jnp.dtype(dtype).itemsize
    M = N * D

    # dtype-appropriate sublane multiple (packed sublanes for sub-32-bit dtypes).
    sub = max(8, 32 // itemsize)
    # Period (in 128-lane rows) of the broadcast pattern, rounded to sublanes.
    period = D // math.gcd(D, _LANES)
    pattern_rows = _lcm(period, sub)

    # Small problems (or pathological D): a broadcast add is something XLA
    # already emits near the HBM roofline; Pallas launch + per-step overhead
    # would dominate.  Threshold is a heuristic -- measure to tune.
    if B * M * itemsize < min_pallas_bytes or M < _LANES or pattern_rows > 1024:
        return xyz + delta.astype(dtype)

    # ---- lane-dense view -------------------------------------------------
    r_full, rem = divmod(M, _LANES)
    padded = rem != 0
    R = r_full + (1 if padded else 0)

    flat = xyz.reshape(B, M)
    if padded:
        # N*D is not a multiple of 128: pad the <=127-element tail so the
        # (B, R, 128) view exists.  This costs one extra HBM pass each way
        # (pad + final slice); the common point-cloud sizes (N a multiple of
        # 128) take the zero-copy branch below.
        flat = jnp.pad(flat, ((0, 0), (0, _LANES - rem)))
    x3 = flat.reshape(B, R, _LANES)

    # ---- tile size -------------------------------------------------------
    # Rows per tile: multiple of the pattern period (=> pattern is tile-
    # invariant and sublane-aligned), close to block_rows (~2 MiB for f32),
    # never wastefully larger than the batch itself.
    quantum = pattern_rows
    tr = quantum * max(1, min(block_rows // quantum, pl.cdiv(R, quantum)))
    if B * pl.cdiv(R, tr) < 2 and R > quantum:
        # Guarantee >=2 grid points so both v7x TensorCores get work.
        tr = quantum * pl.cdiv(pl.cdiv(R, 2), quantum)
    num_j = pl.cdiv(R, tr)          # last tile may be ragged; Pallas masks it
    reps = tr // pattern_rows

    # ---- hoisted broadcast pattern ----------------------------------------
    # pattern[b, r, c] = delta[b, (r*128 + c) % D]; tiny (B * PR * 128 elems).
    flat_idx = jnp.arange(pattern_rows * _LANES, dtype=jnp.int32) % D
    pattern = jnp.take(delta.reshape(B, D).astype(dtype), flat_idx, axis=1)
    pattern = pattern.reshape(B, pattern_rows, _LANES)

    kernel = functools.partial(_translation_kernel, reps=reps)

    out3 = pl.pallas_call(
        kernel,
        out_shape=jax.ShapeDtypeStruct((B, R, _LANES), dtype),
        grid=(B, num_j),
        in_specs=[
            # pattern: resident per-batch block, only re-DMA'd when b changes.
            pl.BlockSpec((1, pattern_rows, _LANES), lambda b, j: (b, 0, 0)),
            # xyz: contiguous per-batch row tile; (tr, 128) keeps DMA / vst dense.
            pl.BlockSpec((1, tr, _LANES), lambda b, j: (b, j, 0)),
        ],
        out_specs=pl.BlockSpec((1, tr, _LANES), lambda b, j: (b, j, 0)),
        # Alias xyz -> output when the caller can donate it (saves an HBM alloc).
        input_output_aliases=({1: 0} if donate_input else {}),
        compiler_params=pltpu.CompilerParams(
            # Every output block is written exactly once -> both axes parallel,
            # so v7x's two TensorCores share the grid even for tiny B.
            dimension_semantics=("parallel", "parallel"),
            # Headroom for larger user-chosen block_rows; default tiles use ~8 MiB.
            vmem_limit_bytes=32 * 1024 * 1024,
        ),
    )(pattern, x3)

    if padded:
        return out3.reshape(B, R * _LANES)[:, :M].reshape(B, N, D)
    return out3.reshape(B, N, D)


def translation_module(xyz: jax.Array, key: jax.Array) -> jax.Array:
    """Mirrors Translation.forward: delta ~ N(0,1) per batch, broadcast-added."""
    B, _, D = xyz.shape
    delta = jax.random.normal(key, (B, 1, D), dtype=jnp.float32).astype(xyz.dtype)
    return translation(xyz, delta)


if __name__ == "__main__":
    key = jax.random.PRNGKey(0)
    k1, k2, k3, k4, k5, k6 = jax.random.split(key, 6)
    D = 3

    # 1) Zero-copy fast path: N*D is a multiple of 128 (no pad, no slice).
    B, N = 2, 16384
    xyz = jax.random.normal(k1, (B, N, D), dtype=jnp.float32)
    delta = jax.random.normal(k2, (B, 1, D), dtype=jnp.float32)
    out = jax.block_until_ready(translation(xyz, delta))
    assert out.shape == (B, N, D)
    assert jnp.allclose(out, xyz + delta, atol=1e-6), "fast path mismatch"

    # 1b) Force several row-tiles: checks the pattern is tile-invariant.
    out_mt = jax.block_until_ready(translation(xyz, delta, block_rows=96))
    assert jnp.allclose(out_mt, xyz + delta, atol=1e-6), "multi-tile mismatch"

    # 2) Ragged path: N*D % 128 != 0 exercises the pad/slice fallback and the
    #    masked (partial) final row-tile.
    B2, N2 = 2, 20000
    xyz2 = jax.random.normal(k3, (B2, N2, D), dtype=jnp.float32)
    delta2 = jax.random.normal(k4, (B2, 1, D), dtype=jnp.float32)
    out2 = jax.block_until_ready(translation(xyz2, delta2))
    assert jnp.allclose(out2, xyz2 + delta2, atol=1e-6), "ragged path mismatch"

    # 3) Tiny input: XLA fallback (Pallas would only add overhead here).
    xyz3 = jax.random.normal(k5, (2, 8, D), dtype=jnp.float32)
    delta3 = jax.random.normal(k6, (2, 1, D), dtype=jnp.float32)
    out3 = jax.block_until_ready(translation(xyz3, delta3))
    assert jnp.allclose(out3, xyz3 + delta3, atol=1e-6), "fallback mismatch"

    # 4) Module-style entry point (random per-batch delta, like Translation.forward).
    out_m = jax.block_until_ready(translation_module(xyz, jax.random.PRNGKey(1)))
    assert out_m.shape == (B, N, D)

    print("KERNEL_OK")
</pallas_src>

<mosaic_0001>
module attributes {stable_mosaic.version = 11 : i64} {
  func.func @_translation_kernel(%arg0: i32, %arg1: i32, %arg2: memref<1x24x128xf32, #tpu.memory_space<vmem>>, %arg3: memref<1x384x128xf32, #tpu.memory_space<vmem>>, %arg4: memref<1x384x128xf32, #tpu.memory_space<vmem>>) attributes {dimension_semantics = [#tpu.dimension_semantics<parallel>, #tpu.dimension_semantics<parallel>], iteration_bounds = array<i64: 2, 1>, scalar_prefetch = 0 : i64, scratch_operands = 0 : i64, tpu.core_type = #tpu.core_type<tc>, window_params = [{transform_indices = @transform_0, window_bounds = array<i64: 1, 24, 128>}, {transform_indices = @transform_1, window_bounds = array<i64: 1, 384, 128>}, {transform_indices = @transform_2, window_bounds = array<i64: 1, 384, 128>}]} {
    %c0 = arith.constant 0 : index
    %c0_0 = arith.constant 0 : index
    %c0_1 = arith.constant 0 : index
    %0 = vector.load %arg3[%c0, %c0_0, %c0_1] : memref<1x384x128xf32, #tpu.memory_space<vmem>>, vector<1x384x128xf32>
    %1 = vector.shape_cast %0 : vector<1x384x128xf32> to vector<1x16x24x128xf32>
    %c0_2 = arith.constant 0 : index
    %c0_3 = arith.constant 0 : index
    %c0_4 = arith.constant 0 : index
    %2 = vector.load %arg2[%c0_2, %c0_3, %c0_4] : memref<1x24x128xf32, #tpu.memory_space<vmem>>, vector<1x24x128xf32>
    %3 = vector.shape_cast %2 : vector<1x24x128xf32> to vector<1x1x24x128xf32>
    %4 = vector.broadcast %3 : vector<1x1x24x128xf32> to vector<1x16x24x128xf32>
    %5 = arith.addf %1, %4 : vector<1x16x24x128xf32>
    %6 = vector.shape_cast %5 : vector<1x16x24x128xf32> to vector<1x384x128xf32>
    %c0_5 = arith.constant 0 : index
    %c0_6 = arith.constant 0 : index
    %c0_7 = arith.constant 0 : index
    %7 = vector.load %arg4[%c0_5, %c0_6, %c0_7] : memref<1x384x128xf32, #tpu.memory_space<vmem>>, vector<1x384x128xf32>
    tpu.vector_store %arg4[%c0_5, %c0_6, %c0_7], %6 {strides = array<i32>} : memref<1x384x128xf32, #tpu.memory_space<vmem>>, vector<1x384x128xf32>,
    return
  }
  func.func @transform_0(%arg0: i32, %arg1: i32) -> (i32, i32, i32) {
    %c0_i32 = arith.constant 0 : i32
    %c0_i32_0 = arith.constant 0 : i32
    %c0_i32_1 = arith.constant 0 : i32
    return %arg0, %c0_i32, %c0_i32_0 : i32, i32, i32
  }
  func.func @transform_1(%arg0: i32, %arg1: i32) -> (i32, i32, i32) {
    %c0_i32 = arith.constant 0 : i32
    %c0_i32_0 = arith.constant 0 : i32
    return %arg0, %arg1, %c0_i32 : i32, i32, i32
  }
  func.func @transform_2(%arg0: i32, %arg1: i32) -> (i32, i32, i32) {
    %c0_i32 = arith.constant 0 : i32
    %c0_i32_0 = arith.constant 0 : i32
    return %arg0, %arg1, %c0_i32 : i32, i32, i32
  }
}

</mosaic_0001>

<bundles_post_ra>
// kernel: tpu_custom_call.1
= control target key start
LH: loop header
LB: loop body
LE: loop exit
PB: predicated region body
PF: predicated region fallthrough
CT: control target
= control target key end

     0   :  { %7 = vsyncpa [#allocation3], 0  ;;  %s1080_s0 = inlined_call_operand.hbm [shape: f32[2,24,128], index: 0, kind: input, shape index: {}]   ;;  %s1081_s1 = inlined_call_operand.hbm [shape: f32[2,384,128], index: 1, kind: input, shape index: {}]   ;;  %s1082_s2 = inlined_call_operand.hbm [shape: f32[2,384,128], index: 2, kind: output, shape index: {}]  }
   0x1   :  { %9 = vsyncpa [#allocation3 + $0x1], 0 }
   0x2   :  { %10 = vsyncpa [#allocation6], 0 }
   0x3   :  { %12 = vsyncpa [#allocation6 + $0x1], 0 }
   0x4   :  { %13 = vsyncpa [#allocation4], 0 }
   0x5   :  { %15 = vsyncpa [#allocation4 + $0x1], 0  ;;  %s747_s9 = smov 0   ;;  %s749_s10 = smov 0  }
   0x6   :  { %s751_s11 = smov 0   ;;  %s753_s12 = smov 0  }
   0x7   :  { %s755_s13 = smov 0   ;;  %s757_s14 = smov 0  }
   0x8 LB: > { %s495_s15 = sadd.s32 4294967295, %s723_s14   ;;  %s496_s16 = sadd.s32 4294967294, %s723_s14   ;;  %s723_s14 = sphi %s757_s14, %s21_s14   ;;  %s719_s13 = sphi %s755_s13, %s1093_s13   ;;  %s715_s12 = sphi %s753_s12, %s1092_s12   ;;  %s711_s11 = sphi %s751_s11, %s1091_s11   ;;  %s707_s10 = sphi %s749_s10, %s1090_s10   ;;  %s703_s9 = sphi %s747_s9, %s1089_s9  }
   0x9   : > { %s33_s17 = sadd.s32 1, %s719_s13  ;;  %s40_s18 = sadd.s32 1, %s711_s11 }
   0xa   : > { %p35_p0 = scmp.ge.s32.totalorder %s33_s17, 2  ;;  %p47_p1 = scmp.ne.s32.totalorder %s711_s11, %s707_s10 }
   0xb   : > { %p48_p2 = scmp.eq.s32.totalorder %s723_s14, 0  ;;  %p53_p3 = scmp.ne.s32.totalorder %s707_s10, %s703_s9 }
   0xc   : > { %s1095_s17 = smov (%p35_p0, %s33_s17), 0  ;;  %p54_p5 = scmp.eq.s32.totalorder %s495_s15, 0 }
   0xd   : > { %p788_p4 = por %p48_p2, %p47_p1  ;;  %s37_s20 = ssub.s32 %s719_s13, %s1095_s17 }
   0xe   : > { %p107_p6 = scmp.eq.s32.totalorder %s495_s15, 1  ;;  %p38_p7 = scmp.eq.s32.totalorder %s37_s20, 0 }
   0xf   : > { %p794_p8 = por %p54_p5, %p53_p3  ;;  %p113_p10 = scmp.eq.s32.totalorder %s496_s16, 1 }
  0x10   : > { %p798_p9 = por %p107_p6, %p47_p1  ;;  %p498_p12 = scmp.ge.s32.totalorder %s723_s14, 2 }
  0x11   : > { %s803_s23 = scalar_select %p38_p7, %s711_s11, %s40_s18  }
  0x12   : > { %p805_p11 = por %p113_p10, %p53_p3  ;;  %p529_p13 = scmp.lt.s32.totalorder %s723_s14, 2 }
  0x13   : > { %s812_s25 = sand.u32 1, %s711_s11   ;;  %s506_s27 = smul.u32 384, %s719_s13 }
  0x14   : > { %s505_s26 = smul.u32 24, %s812_s25  ;;  %p818_p0 = pnand %p529_p13, %p788_p4 }
  0x15   : > { %s143_s3 = scalar_lea.hbm %s1080_s0, %s506_s27  ;;  %p501_p1 = scmp.ge.s32.totalorder %s723_s14, 1 }
  0x16   : > { %s137_s4 = scalar_lea.vmem [#allocation2], %s505_s26  ;;  %s134_s6 = scalar_lea.sflag [#allocation3], %s812_s25 }
  0x17   : > { %s144_s5 = sshll.u32 %s137_s4, 4  ;;  %p585_p2 = pneg %p818_p0  ;;  %s145_s5 = int_to_ptr.vmem [resolvable:$true] %s144_s5 }
  0x18   : > { %s596_s7 = scalar_lea.vmem %s145_s5, 384  ;;  %s725_s8 = smov [#allocation2]  }
  0x19   : > { %p597_p3 = scmp.ne.s32.totalorder %s145_s5, %s596_s7  ;;  %s601_s15 = sshll.u32 %s725_s8, 4  ;;  %s602_s15 = int_to_ptr.vmem [resolvable:$false] %s601_s15 }
  0x1a   : > { %s603_s16 = scalar_lea.vmem %s602_s15, 768  ;;  %p604_p6 = scmp.lt.s32.totalorder %s145_s5, %s602_s15 }
  0x1b   : > { %p599_p4 = pnand %p597_p3, %p585_p2  ;;  %p605_p7 = scmp.lt.s32.totalorder %s603_s16, %s596_s7 }
  0x1d   : > { %p600_p5 = pneg %p599_p4  ;;  %p606_p10 = por %p605_p7, %p604_p6 }
  0x1f   : > { %p607_p13 = pnand %p606_p10, %p600_p5 }
  0x21   : > { %610 = shalt.err (!%p607_p13)
}
  0x22   : > { %s726_s18 = smov 128   ;;  %s727_s19 = smov 8  }
  0x23   : > { %521 = dma.hbm_to_vmem [thread:$0]  (!%p818_p0), %s143_s3, 384, %s145_s5, %s134_s6, %s726_s18, %s726_s18, %s727_s19  }
  0x24   : > { %p175_p3 = scmp.lt.s32.totalorder %s723_s14, 3  ;;  %s507_s20 = smul.u32 384, %s812_s25 }
  0x25   : > { %s508_s27 = smul.u32 6144, %s719_s13  ;;  %s155_s15 = scalar_lea.sflag [#allocation6], %s812_s25 }
  0x26   : > { %p838_p4 = pnand %p501_p1, %p175_p3  ;;  %s158_s7 = scalar_lea.vmem [#allocation5], %s507_s20 }
  0x27   : > { %s166_s4 = scalar_lea.hbm %s1081_s1, %s508_s27  ;;  %s167_s8 = sshll.u32 %s158_s7, 4  ;;  %s168_s8 = int_to_ptr.vmem [resolvable:$true] %s167_s8 }
  0x28   : > { %s624_s16 = scalar_lea.vmem %s168_s8, 6144  ;;  %s728_s3 = smov [#allocation5]  }
  0x29   : > { %p625_p5 = scmp.ne.s32.totalorder %s168_s8, %s624_s16  ;;  %s629_s5 = sshll.u32 %s728_s3, 4  ;;  %s630_s5 = int_to_ptr.vmem [resolvable:$false] %s629_s5 }
  0x2a   : > { %s631_s6 = scalar_lea.vmem %s630_s5, 12288  ;;  %p632_p1 = scmp.lt.s32.totalorder %s168_s8, %s630_s5 }
  0x2b   : > { %p627_p6 = pnand %p625_p5, %p585_p2  ;;  %p633_p10 = scmp.lt.s32.totalorder %s631_s6, %s624_s16 }
  0x2d   : > { %p628_p7 = pneg %p627_p6  ;;  %p634_p13 = por %p633_p10, %p632_p1 }
  0x2f   : > { %p635_p3 = pnand %p634_p13, %p628_p7 }
  0x31   : > { %638 = shalt.err (!%p635_p3)
}
  0x32   : > { %524 = dma.hbm_to_vmem [thread:$0]  (!%p818_p0), %s166_s4, 6144, %s168_s8, %s155_s15, %s726_s18, %s726_s18, %s727_s19  }
  0x33   : > { %179 = sbr.rel (%p838_p4) target bundleno = 102 (0x66), region = 28  ;;  %s855_s25 = sand.u32 (!%p838_p4), 1, %s707_s10  }
  0x34   : > { %s509_s20 = smul.u32 (!%p838_p4), 24, %s855_s25  ;;  %s182_s27 = scalar_lea.sflag (!%p838_p4), [#allocation3], %s855_s25 }
  0x36   : > { %s185_s29 = scalar_lea.vmem (!%p838_p4), [#allocation2], %s509_s20 }
  0x38   : > { %690 = dma.done.wait (%p794_p8), %s182_s27, 384  }
  0x39   : > { %692 = vsyncadd (%p794_p8), %s182_s27, 4294966912  ;;  %s510_s28 = smul.u32 384, %s855_s25  ;;  %s191_s18 = scalar_lea.sflag [#allocation6], %s855_s25 }
  0x3b   : > { %s865_s19 = scalar_lea.vmem [#allocation5], %s510_s28 }
  0x3c   : > { %694 = dma.done.wait (%p794_p8), %s191_s18, 6144  }
  0x3d   : > { %696 = vsyncadd (%p794_p8), %s191_s18, 4294961152  ;;  %v222_v0 = vld [vmem:[%s865_s19] sm:$0xff]  ;;  %v872_v1 = vld [vmem:[%s185_s29] sm:$0xff]  ;;  %s886_s21 = scalar_lea.vmem [#allocation7], %s510_s28  ;;  %s511_s26 = smul.u32 6144, %s715_s12 }
  0x3e   : > { %v223_v2 = vld [vmem:[%s865_s19 + $0x8] sm:$0xff]  ;;  %v273_v3 = vadd.f32 %v872_v1, %v222_v0  ;;  %v876_v4 = vld [vmem:[%s185_s29 + $0x8] sm:$0xff]  ;;  %v879_v6 = vld [vmem:[%s185_s29 + $0x10] sm:$0xff]  ;;  %s385_s30 = sshll.u32 %s886_s21, 4  ;;  %s370_s15 = scalar_lea.sflag [#allocation4], %s855_s25  ;;  %s1013_s30 = int_to_ptr.vmem [resolvable:$true] %s385_s30 }
  0x3f   : > { %v224_v5 = vld [vmem:[%s865_s19 + $0x10] sm:$0xff]  ;;  %v274_v7 = vadd.f32 %v876_v4, %v223_v2  ;;  %v225_v9 = vld [vmem:[%s865_s19 + $0x18] sm:$0xff]  ;;  %v226_v10 = vld [vmem:[%s865_s19 + $0x20] sm:$0xff]  ;;  %s1026_s8 = scalar_lea.hbm %s1082_s2, %s511_s26  ;;  %s639_s16 = scalar_lea.vmem %s1013_s30, 6144 }
  0x40   : > { %v275_v8 = vadd.f32 %v879_v6, %v224_v5  ;;  %v227_v11 = vld [vmem:[%s865_s19 + $0x28] sm:$0xff]  ;;  %321 = vst [vmem:[%s886_s21] sm:$0xff] %v273_v3  ;;  %v276_v12 = vadd.f32 %v872_v1, %v225_v9  ;;  %v277_v13 = vadd.f32 %v876_v4, %v226_v10  ;;  %v228_v15 = vld [vmem:[%s865_s19 + $0x30] sm:$0xff]  ;;  %v229_v16 = vld [vmem:[%s865_s19 + $0x38] sm:$0xff]  ;;  %p640_p8 = scmp.ne.s32.totalorder %s1013_s30, %s639_s16  ;;  %s729_s3 = smov [#allocation7]  }
  0x41   : > { %v278_v14 = vadd.f32 %v879_v6, %v227_v11  ;;  %v230_v17 = vld [vmem:[%s865_s19 + $0x40] sm:$0xff]  ;;  %322 = vst [vmem:[%s886_s21 + $0x8] sm:$0xff] %v274_v7  ;;  %v279_v18 = vadd.f32 %v872_v1, %v228_v15  ;;  %v280_v19 = vadd.f32 %v876_v4, %v229_v16  ;;  %v231_v21 = vld [vmem:[%s865_s19 + $0x48] sm:$0xff]  ;;  %v232_v22 = vld [vmem:[%s865_s19 + $0x50] sm:$0xff]  ;;  %s643_s12 = sshll.u32 %s729_s3, 4  ;;  %s644_s12 = int_to_ptr.vmem [resolvable:$false] %s643_s12 }
  0x42   : > { %323 = vst [vmem:[%s886_s21 + $0x10] sm:$0xff] %v275_v8  ;;  %v281_v20 = vadd.f32 %v879_v6, %v230_v17  ;;  %v233_v23 = vld [vmem:[%s865_s19 + $0x58] sm:$0xff]  ;;  %324 = vst [vmem:[%s886_s21 + $0x18] sm:$0xff] %v276_v12  ;;  %v282_v24 = vadd.f32 %v872_v1, %v231_v21  ;;  %v283_v25 = vadd.f32 %v876_v4, %v232_v22  ;;  %v234_v27 = vld [vmem:[%s865_s19 + $0x60] sm:$0xff]  ;;  %p641_p0 = pnand %p640_p8, %p798_p9  ;;  %s645_s5 = scalar_lea.vmem %s644_s12, 12288 }
  0x43   : > { %325 = vst [vmem:[%s886_s21 + $0x20] sm:$0xff] %v277_v13  ;;  %326 = vst [vmem:[%s886_s21 + $0x28] sm:$0xff] %v278_v14  ;;  %v284_v26 = vadd.f32 %v879_v6, %v233_v23  ;;  %v235_v28 = vld [vmem:[%s865_s19 + $0x68] sm:$0xff]  ;;  %v236_v29 = vld [vmem:[%s865_s19 + $0x70] sm:$0xff]  ;;  %v285_v30 = vadd.f32 %v872_v1, %v234_v27  ;;  %p646_p4 = scmp.lt.s32.totalorder %s1013_s30, %s644_s12  ;;  %p647_p5 = scmp.lt.s32.totalorder %s645_s5, %s639_s16 }
  0x44   : > { %327 = vst [vmem:[%s886_s21 + $0x30] sm:$0xff] %v279_v18  ;;  %328 = vst [vmem:[%s886_s21 + $0x38] sm:$0xff] %v280_v19  ;;  %v286_v31 = vadd.f32 %v876_v4, %v235_v28  ;;  %v287_v32 = vadd.f32 %v879_v6, %v236_v29  ;;  %v237_v33 = vld [vmem:[%s865_s19 + $0x78] sm:$0xff]  ;;  %v238_v34 = vld [vmem:[%s865_s19 + $0x80] sm:$0xff]  ;;  %p642_p2 = pneg %p641_p0 }
  0x45   : > { %329 = vst [vmem:[%s886_s21 + $0x40] sm:$0xff] %v281_v20  ;;  %v239_v35 = vld [vmem:[%s865_s19 + $0x88] sm:$0xff]  ;;  %330 = vst [vmem:[%s886_s21 + $0x48] sm:$0xff] %v282_v24  ;;  %v288_v36 = vadd.f32 %v872_v1, %v237_v33  ;;  %v289_v37 = vadd.f32 %v876_v4, %v238_v34  ;;  %v240_v39 = vld [vmem:[%s865_s19 + $0x90] sm:$0xff]  ;;  %p648_p6 = por %p647_p5, %p646_p4 }
  0x46   : > { %331 = vst [vmem:[%s886_s21 + $0x50] sm:$0xff] %v283_v25  ;;  %332 = vst [vmem:[%s886_s21 + $0x58] sm:$0xff] %v284_v26  ;;  %v290_v38 = vadd.f32 %v879_v6, %v239_v35  ;;  %v241_v40 = vld [vmem:[%s865_s19 + $0x98] sm:$0xff]  ;;  %v242_v41 = vld [vmem:[%s865_s19 + $0xa0] sm:$0xff]  ;;  %v291_v42 = vadd.f32 %v872_v1, %v240_v39 }
  0x47   : > { %333 = vst [vmem:[%s886_s21 + $0x60] sm:$0xff] %v285_v30  ;;  %334 = vst [vmem:[%s886_s21 + $0x68] sm:$0xff] %v286_v31  ;;  %v292_v43 = vadd.f32 %v876_v4, %v241_v40  ;;  %v293_v44 = vadd.f32 %v879_v6, %v242_v41  ;;  %v243_v45 = vld [vmem:[%s865_s19 + $0xa8] sm:$0xff]  ;;  %v244_v46 = vld [vmem:[%s865_s19 + $0xb0] sm:$0xff]  ;;  %p649_p7 = pnand %p648_p6, %p642_p2 }
  0x48   : > { %335 = vst [vmem:[%s886_s21 + $0x70] sm:$0xff] %v287_v32  ;;  %v245_v47 = vld [vmem:[%s865_s19 + $0xb8] sm:$0xff]  ;;  %336 = vst [vmem:[%s886_s21 + $0x78] sm:$0xff] %v288_v36  ;;  %v294_v48 = vadd.f32 %v872_v1, %v243_v45  ;;  %v295_v49 = vadd.f32 %v876_v4, %v244_v46  ;;  %v246_v51 = vld [vmem:[%s865_s19 + $0xc0] sm:$0xff] }
  0x49   : > { %337 = vst [vmem:[%s886_s21 + $0x80] sm:$0xff] %v289_v37  ;;  %338 = vst [vmem:[%s886_s21 + $0x88] sm:$0xff] %v290_v38  ;;  %v296_v50 = vadd.f32 %v879_v6, %v245_v47  ;;  %v247_v52 = vld [vmem:[%s865_s19 + $0xc8] sm:$0xff]  ;;  %v248_v53 = vld [vmem:[%s865_s19 + $0xd0] sm:$0xff]  ;;  %v297_v54 = vadd.f32 %v872_v1, %v246_v51 }
  0x4a   : > { %339 = vst [vmem:[%s886_s21 + $0x90] sm:$0xff] %v291_v42  ;;  %340 = vst [vmem:[%s886_s21 + $0x98] sm:$0xff] %v292_v43  ;;  %v298_v55 = vadd.f32 %v876_v4, %v247_v52  ;;  %v299_v56 = vadd.f32 %v879_v6, %v248_v53  ;;  %v249_v57 = vld [vmem:[%s865_s19 + $0xd8] sm:$0xff]  ;;  %v250_v58 = vld [vmem:[%s865_s19 + $0xe0] sm:$0xff] }
  0x4b   : > { %341 = vst [vmem:[%s886_s21 + $0xa0] sm:$0xff] %v293_v44  ;;  %v251_v59 = vld [vmem:[%s865_s19 + $0xe8] sm:$0xff]  ;;  %342 = vst [vmem:[%s886_s21 + $0xa8] sm:$0xff] %v294_v48  ;;  %v300_v60 = vadd.f32 %v872_v1, %v249_v57  ;;  %v301_v61 = vadd.f32 %v876_v4, %v250_v58  ;;  %v252_v63 = vld [vmem:[%s865_s19 + $0xf0] sm:$0xff] }
  0x4c   : > { %343 = vst [vmem:[%s886_s21 + $0xb0] sm:$0xff] %v295_v49  ;;  %344 = vst [vmem:[%s886_s21 + $0xb8] sm:$0xff] %v296_v50  ;;  %v302_v62 = vadd.f32 %v879_v6, %v251_v59  ;;  %v253_v0 = vld [vmem:[%s865_s19 + $0xf8] sm:$0xff]  ;;  %v254_v2 = vld [vmem:[%s865_s19 + $0x100] sm:$0xff]  ;;  %v303_v3 = vadd.f32 %v872_v1, %v252_v63 }
  0x4d   : > { %345 = vst [vmem:[%s886_s21 + $0xc0] sm:$0xff] %v297_v54  ;;  %346 = vst [vmem:[%s886_s21 + $0xc8] sm:$0xff] %v298_v55  ;;  %v304_v5 = vadd.f32 %v876_v4, %v253_v0  ;;  %v305_v7 = vadd.f32 %v879_v6, %v254_v2  ;;  %v255_v8 = vld [vmem:[%s865_s19 + $0x108] sm:$0xff]  ;;  %v256_v9 = vld [vmem:[%s865_s19 + $0x110] sm:$0xff] }
  0x4e   : > { %347 = vst [vmem:[%s886_s21 + $0xd0] sm:$0xff] %v299_v56  ;;  %v257_v10 = vld [vmem:[%s865_s19 + $0x118] sm:$0xff]  ;;  %348 = vst [vmem:[%s886_s21 + $0xd8] sm:$0xff] %v300_v60  ;;  %v306_v11 = vadd.f32 %v872_v1, %v255_v8  ;;  %v307_v12 = vadd.f32 %v876_v4, %v256_v9  ;;  %v258_v14 = vld [vmem:[%s865_s19 + $0x120] sm:$0xff] }
  0x4f   : > { %349 = vst [vmem:[%s886_s21 + $0xe0] sm:$0xff] %v301_v61  ;;  %350 = vst [vmem:[%s886_s21 + $0xe8] sm:$0xff] %v302_v62  ;;  %v308_v13 = vadd.f32 %v879_v6, %v257_v10  ;;  %v259_v15 = vld [vmem:[%s865_s19 + $0x128] sm:$0xff]  ;;  %v260_v16 = vld [vmem:[%s865_s19 + $0x130] sm:$0xff]  ;;  %v309_v17 = vadd.f32 %v872_v1, %v258_v14 }
  0x50   : > { %351 = vst [vmem:[%s886_s21 + $0xf0] sm:$0xff] %v303_v3  ;;  %352 = vst [vmem:[%s886_s21 + $0xf8] sm:$0xff] %v304_v5  ;;  %v310_v18 = vadd.f32 %v876_v4, %v259_v15  ;;  %v311_v19 = vadd.f32 %v879_v6, %v260_v16  ;;  %v261_v20 = vld [vmem:[%s865_s19 + $0x138] sm:$0xff]  ;;  %v262_v21 = vld [vmem:[%s865_s19 + $0x140] sm:$0xff] }
  0x51   : > { %353 = vst [vmem:[%s886_s21 + $0x100] sm:$0xff] %v305_v7  ;;  %v263_v22 = vld [vmem:[%s865_s19 + $0x148] sm:$0xff]  ;;  %354 = vst [vmem:[%s886_s21 + $0x108] sm:$0xff] %v306_v11  ;;  %v312_v23 = vadd.f32 %v872_v1, %v261_v20  ;;  %v313_v24 = vadd.f32 %v876_v4, %v262_v21  ;;  %v264_v26 = vld [vmem:[%s865_s19 + $0x150] sm:$0xff] }
  0x52   : > { %355 = vst [vmem:[%s886_s21 + $0x110] sm:$0xff] %v307_v12  ;;  %356 = vst [vmem:[%s886_s21 + $0x118] sm:$0xff] %v308_v13  ;;  %v314_v25 = vadd.f32 %v879_v6, %v263_v22  ;;  %v265_v27 = vld [vmem:[%s865_s19 + $0x158] sm:$0xff]  ;;  %v266_v28 = vld [vmem:[%s865_s19 + $0x160] sm:$0xff]  ;;  %v315_v29 = vadd.f32 %v872_v1, %v264_v26 }
  0x53   : > { %357 = vst [vmem:[%s886_s21 + $0x120] sm:$0xff] %v309_v17  ;;  %358 = vst [vmem:[%s886_s21 + $0x128] sm:$0xff] %v310_v18  ;;  %v316_v30 = vadd.f32 %v876_v4, %v265_v27  ;;  %v317_v31 = vadd.f32 %v879_v6, %v266_v28  ;;  %v267_v32 = vld [vmem:[%s865_s19 + $0x168] sm:$0xff]  ;;  %v268_v33 = vld [vmem:[%s865_s19 + $0x170] sm:$0xff] }
  0x54   : > { %359 = vst [vmem:[%s886_s21 + $0x130] sm:$0xff] %v311_v19  ;;  %v269_v34 = vld [vmem:[%s865_s19 + $0x178] sm:$0xff]  ;;  %360 = vst [vmem:[%s886_s21 + $0x138] sm:$0xff] %v312_v23  ;;  %v318_v35 = vadd.f32 %v872_v1, %v267_v32  ;;  %v319_v36 = vadd.f32 %v876_v4, %v268_v33 }
  0x55   : > { %361 = vst [vmem:[%s886_s21 + $0x140] sm:$0xff] %v313_v24  ;;  %362 = vst [vmem:[%s886_s21 + $0x148] sm:$0xff] %v314_v25  ;;  %v320_v37 = vadd.f32 %v879_v6, %v269_v34 }
  0x56   : > { %363 = vst [vmem:[%s886_s21 + $0x150] sm:$0xff] %v315_v29  ;;  %364 = vst [vmem:[%s886_s21 + $0x158] sm:$0xff] %v316_v30 }
  0x57   : > { %365 = vst [vmem:[%s886_s21 + $0x160] sm:$0xff] %v317_v31  ;;  %366 = vst [vmem:[%s886_s21 + $0x168] sm:$0xff] %v318_v35 }
  0x58   : > { %367 = vst [vmem:[%s886_s21 + $0x170] sm:$0xff] %v319_v36  ;;  %368 = vst [vmem:[%s886_s21 + $0x178] sm:$0xff] %v320_v37 }
  0x59   : > { %652 = shalt.err (!%p649_p7)
}
  0x5a   : > { %s653_s6 = scalar_lea.hbm %s1026_s8, 6144  ;;  %s657_s29 = scalar_lea.hbm %s1082_s2, 12288 }
  0x5b   : > { %p654_p1 = scmp.ne.s32.totalorder %s1026_s8, %s653_s6  ;;  %p658_p3 = scmp.lt.s32.totalorder %s1026_s8, %s1082_s2 }
  0x5c   : > { %p659_p8 = scmp.lt.s32.totalorder %s657_s29, %s653_s6 }
  0x5d   : > { %p655_p10 = pnand %p654_p1, %p798_p9 }
  0x5e   : > { %p660_p0 = por %p659_p8, %p658_p3 }
  0x5f   : > { %p656_p13 = pneg %p655_p10 }
  0x61   : > { %p661_p2 = pnand %p660_p0, %p656_p13 }
  0x63   : > { %664 = shalt.err (!%p661_p2)
}
  0x64   : > { %s730_s19 = smov 128   ;;  %s731_s21 = smov 8  }
  0x65   : > { %516 = dma.vmem_to_hbm [thread:$0]  (%p798_p9), %s1013_s30, 6144, %s1026_s8, %s370_s15, %s730_s19, %s730_s19, %s731_s21  }
  0x66 PF: > { %s400_s26 = sand.u32 1, %s703_s9   ;;  %p526_p4 = pnand %p498_p12, %p805_p11 }
  0x67   : > { %s401_s4 = scalar_lea.sflag [#allocation4], %s400_s26 }
  0x68   : > { %p527_p5 = pneg %p526_p4 }
  0x6a   : > { %698 = dma.done.wait (%p527_p5), %s401_s4, 6144  }
  0x6b   : > { %700 = vsyncadd (%p527_p5), %s401_s4, 4294961152  ;;  %s21_s14 = sadd.s32 1, %s723_s14   ;;  %s1089_s9 = smov %s707_s10 }
  0x6c   : > { %p18_p6 = scmp.ge.s32.totalorder %s21_s14, 4   ;;  %s1090_s10 = smov %s711_s11 }
  0x6d   : > { %s1091_s11 = smov %s803_s23  ;;  %s1092_s12 = smov %s719_s13 }
  0x6e   : > { %s1093_s13 = smov %s1095_s17  ;;  %20 = sbr.rel (!%p18_p6) target bundleno = 8 (0x8), region = 86 }
  0x73   :  { %406 = vsyncpa [#allocation3], 1 }
  0x74   :  { %408 = vsyncpa [#allocation3 + $0x1], 1 }
  0x75   :  { %409 = vsyncpa [#allocation6], 1 }
  0x76   :  { %411 = vsyncpa [#allocation6 + $0x1], 1 }
  0x77   :  { %412 = vsyncpa [#allocation4], 1 }
  0x78   :  { %414 = vsyncpa [#allocation4 + $0x1], 1 }

</bundles_post_ra>
